<compile_context>
chip_gen: v5e
topology: v5e:2x2
jax: 0.10.0
libtpu: 0.0.40
codegen_flags: <defaults>
</compile_context>

<pallas_src>
import functools

import jax
import jax.numpy as jnp
from jax.experimental import pallas as pl
from jax.experimental.pallas import tpu as pltpu

_EPS = 1e-5
_LANE = 128
_TARGET_LANES = 8192          # ~lanes of work per grid step (review: raise cap)
_MAX_NB = 32                  # cap static unroll of the per-batch loop


def _round_up(v, m):
    return (v + m - 1) // m * m


def _pad_and_tile(hw, cap=_TARGET_LANES):
    """Pad H*W to a lane multiple and pick a tile TM that divides the pad."""
    if hw <= cap:
        hwp = _round_up(hw, _LANE)
        return hwp, hwp                      # whole (padded) spatial axis
    hwp = _round_up(hw, 1024)                # pad to 1024 so a good TM exists
    m = hwp // 1024
    for d in range(min(cap // 1024, m), 0, -1):
        if m % d == 0:
            return hwp, d * 1024
    return hwp, 1024


def _pick_nb(n, tm, target=_TARGET_LANES):
    """Batch elements per grid step so nb*tm ~ target lanes of work."""
    if tm >= target:
        return 1
    want = max(1, min(_MAX_NB, target // tm))
    for d in range(min(n, want), 0, -1):
        if n % d == 0:
            return d
    return 1


# ---------------------------------------------------------------------------
# Pass 1: per-batch-block partial statistics of x (colsum and Gram).
#   grid = (N//nb, HWp//TM); batch-block axis "parallel" (v7x megacore),
#   HW axis "arbitrary" (resident output accumulator).
# ---------------------------------------------------------------------------
def _stats_kernel(x_ref, gram_ref, sum_ref):
    @pl.when(pl.program_id(1) == 0)
    def _():
        gram_ref[...] = jnp.zeros_like(gram_ref)
        sum_ref[...] = jnp.zeros_like(sum_ref)

    nb, c, _ = x_ref.shape
    g = jnp.zeros((c, c), jnp.float32)
    s = jnp.zeros((c, 1), jnp.float32)
    for b in range(nb):                              # static unroll, nb small
        xb = x_ref[b]                                # (C_in, TM)
        g = g + jax.lax.dot_general(                 # x x^T on the MXU
            xb, xb, dimension_numbers=(((1,), (1,)), ((), ())),
            preferred_element_type=jnp.float32)
        s = s + jnp.sum(xb, axis=1, keepdims=True)   # (C_in, 1)
    gram_ref[0] += g
    sum_ref[0] += s


def batch_stats(x, nb, tm):
    """x: (N, C_in, HWp) -> partial (G,C_in,C_in) Gram and (G,C_in,1) colsum."""
    N, C_in, HWp = x.shape
    G = N // nb
    return pl.pallas_call(
        _stats_kernel,
        out_shape=(jax.ShapeDtypeStruct((G, C_in, C_in), jnp.float32),
                   jax.ShapeDtypeStruct((G, C_in, 1), jnp.float32)),
        grid=(G, HWp // tm),
        in_specs=[pl.BlockSpec((nb, C_in, tm), lambda g, t: (g, 0, t))],
        out_specs=[pl.BlockSpec((1, C_in, C_in), lambda g, t: (g, 0, 0)),
                   pl.BlockSpec((1, C_in, 1), lambda g, t: (g, 0, 0))],
        compiler_params=pltpu.CompilerParams(
            dimension_semantics=("parallel", "arbitrary")),
    )(x)


# ---------------------------------------------------------------------------
# Pass 2: fold BN into (W_eff, b_eff) in-kernel, then out = W_eff @ x + b_eff.
#   The fold is recomputed every step (tiny, hidden under the tile DMA) so
#   both grid axes can be "parallel" without cross-step state.
# ---------------------------------------------------------------------------
def _apply_kernel(x_ref, gram_ref, sum_ref, w1_ref, b1_ref, gamma_ref,
                  beta_ref, w2_ref, b2_ref, o_ref, *, inv_m, eps):
    # ---- fold (C x C arithmetic; MXU/EUP, negligible vs. DMA) ----
    e_xx = jnp.sum(gram_ref[...], axis=0) * inv_m          # (C_in,C_in) E[x x^T]
    mean_x = jnp.sum(sum_ref[...], axis=0) * inv_m          # (C_in,1)
    w1 = w1_ref[...]                                        # (C_mid,C_in)
    mh0 = jnp.dot(w1, mean_x, preferred_element_type=jnp.float32)   # W1 mu
    e_hh = jnp.sum(jnp.dot(w1, e_xx, preferred_element_type=jnp.float32) * w1,
                   axis=1, keepdims=True)                   # E[(W1 x)^2] per ch
    var_h = e_hh - mh0 * mh0                                # biased batch var
    s = gamma_ref[...] * jax.lax.rsqrt(var_h + eps)         # (C_mid,1)
    w2 = w2_ref[...]
    w_eff = jnp.dot(w2, s * w1, preferred_element_type=jnp.float32)  # (C_out,C_in)
    # b1 - mean_h = b1 - (W1 mu + b1) = -mh0
    b_eff = jnp.dot(w2, s * (-mh0) + beta_ref[...],
                    preferred_element_type=jnp.float32) + b2_ref[...]

    # ---- streaming apply over the (nb, C_in, TM) tile ----
    nb = x_ref.shape[0]
    for b in range(nb):                                     # static unroll
        y = jnp.dot(w_eff, x_ref[b], preferred_element_type=jnp.float32)
        o_ref[b] = (y + b_eff).astype(o_ref.dtype)


def apply_folded(x, gram_p, sum_p, params, *, n_pixels, nb, tm):
    N, C_in, HWp = x.shape
    G = gram_p.shape[0]
    C_mid = params["w1"].shape[0]
    C_out = params["w2"].shape[0]
    kern = functools.partial(_apply_kernel, inv_m=1.0 / float(n_pixels),
                             eps=_EPS)

    def small(shape):
        return pl.BlockSpec(shape, lambda n, t: (0,) * len(shape))

    return pl.pallas_call(
        kern,
        out_shape=jax.ShapeDtypeStruct((N, C_out, HWp), jnp.float32),
        grid=(N // nb, HWp // tm),
        in_specs=[pl.BlockSpec((nb, C_in, tm), lambda n, t: (n, 0, t)),
                  small((G, C_in, C_in)),
                  small((G, C_in, 1)),
                  small((C_mid, C_in)),
                  small((C_mid, 1)),
                  small((C_mid, 1)),
                  small((C_mid, 1)),
                  small((C_out, C_mid)),
                  small((C_out, 1))],
        out_specs=pl.BlockSpec((nb, C_out, tm), lambda n, t: (n, 0, t)),
        compiler_params=pltpu.CompilerParams(
            dimension_semantics=("parallel", "parallel")),
    )(x, gram_p, sum_p, params["w1"], params["b1"], params["gamma"],
      params["beta"], params["w2"], params["b2"])


# ---------------------------------------------------------------------------
# Full forward: conv1 -> BN(batch stats) -> pointwise conv, BN folded.
# ---------------------------------------------------------------------------
def model_forward(x_nchw, params):
    """x_nchw: (N, 32, H, W) f32 -> (N, 64, H, W) f32."""
    N, C_in, H, W = x_nchw.shape
    HW = H * W
    HWp, tm = _pad_and_tile(HW)
    nb = _pick_nb(N, tm)

    x = x_nchw.reshape(N, C_in, HW)                     # free reshape
    if HWp != HW:
        x = jnp.pad(x, ((0, 0), (0, 0), (0, HWp - HW)))  # zero pads -> 0 stats

    gram_p, sum_p = batch_stats(x, nb, tm)              # pass 1 (partials)
    y = apply_folded(x, gram_p, sum_p, params,          # pass 2 (fold + apply)
                     n_pixels=N * HW, nb=nb, tm=tm)
    if HWp != HW:
        y = y[:, :, :HW]
    return y.reshape(N, -1, H, W)


def init_params(key):
    """Shapes mirroring the PyTorch module, in (out, in) matmul layout."""
    k1, k2, k3, k4 = jax.random.split(key, 4)
    c_in, c_mid, c_out = 32, 64, 64
    bound1 = 1.0 / jnp.sqrt(jnp.float32(c_in))          # PyTorch conv default
    bound2 = 1.0 / jnp.sqrt(jnp.float32(c_mid))
    w1 = jax.random.uniform(k1, (c_mid, c_in), jnp.float32, -bound1, bound1)
    b1 = jax.random.uniform(k2, (c_mid, 1), jnp.float32, -bound1, bound1)
    w2 = jax.random.uniform(k3, (c_out, c_mid), jnp.float32, -bound2, bound2)
    b2 = jax.random.uniform(k4, (c_out, 1), jnp.float32, -bound2, bound2)
    gamma = jnp.ones((c_mid, 1), jnp.float32)
    beta = jnp.zeros((c_mid, 1), jnp.float32)
    return {"w1": w1, "b1": b1, "gamma": gamma, "beta": beta,
            "w2": w2, "b2": b2}


if __name__ == "__main__":
    key = jax.random.PRNGKey(0)
    kx, kp = jax.random.split(key)
    # Small input consistent with Conv2d(32, ...): N=2, C=32, H=W=16 (HW=256).
    x = jax.random.normal(kx, (2, 32, 16, 16), jnp.float32)
    params = init_params(kp)

    y = jax.jit(model_forward)(x, params)
    y = jax.block_until_ready(y)

    # Pure-JAX reference of the unfused math (conv1 -> batch BN -> pointwise).
    def ref(xn):
        N, C, H, W = xn.shape
        xf = jnp.transpose(xn, (0, 2, 3, 1)).reshape(N * H * W, C)
        h = xf @ params["w1"].T + params["b1"].T
        mean = jnp.mean(h, axis=0, keepdims=True)
        var = jnp.mean((h - mean) ** 2, axis=0, keepdims=True)   # biased
        hn = (h - mean) * jax.lax.rsqrt(var + _EPS) * params["gamma"].T \
             + params["beta"].T
        o = hn @ params["w2"].T + params["b2"].T
        return o.reshape(N, H, W, -1).transpose(0, 3, 1, 2)

    y_ref = ref(x)
    assert y.shape == (2, 64, 16, 16), y.shape
    err = float(jnp.max(jnp.abs(y - y_ref)))
    assert jnp.allclose(y, y_ref, atol=2e-4, rtol=2e-4), err
    print("KERNEL_OK")
</pallas_src>

<mosaic_0001>
module attributes {stable_mosaic.version = 11 : i64} {
  func.func @_stats_kernel(%arg0: i32, %arg1: i32, %arg2: memref<2x32x256xf32, #tpu.memory_space<vmem>>, %arg3: memref<1x32x32xf32, #tpu.memory_space<vmem>>, %arg4: memref<1x32x1xf32, #tpu.memory_space<vmem>>) attributes {dimension_semantics = [#tpu.dimension_semantics<parallel>, #tpu.dimension_semantics<arbitrary>], iteration_bounds = array<i64: 1, 1>, scalar_prefetch = 0 : i64, scratch_operands = 0 : i64, tpu.core_type = #tpu.core_type<tc>, window_params = [{transform_indices = @transform_0, window_bounds = array<i64: 2, 32, 256>}, {transform_indices = @transform_1, window_bounds = array<i64: 1, 32, 32>}, {transform_indices = @transform_2, window_bounds = array<i64: 1, 32, 1>}]} {
    %c0_i32 = arith.constant 0 : i32
    %0 = arith.cmpi eq, %arg1, %c0_i32 : i32
    %1 = arith.extui %0 : i1 to i32
    %c0_i32_0 = arith.constant 0 : i32
    %2 = arith.cmpi ne, %1, %c0_i32_0 : i32
    scf.if %2 {
      %cst_22 = arith.constant 0.000000e+00 : f32
      %31 = vector.broadcast %cst_22 : f32 to vector<1x32x32xf32>
      %c0_23 = arith.constant 0 : index
      %c0_24 = arith.constant 0 : index
      %c0_25 = arith.constant 0 : index
      %32 = vector.load %arg3[%c0_23, %c0_24, %c0_25] : memref<1x32x32xf32, #tpu.memory_space<vmem>>, vector<1x32x32xf32>
      tpu.vector_store %arg3[%c0_23, %c0_24, %c0_25], %31 {strides = array<i32>} : memref<1x32x32xf32, #tpu.memory_space<vmem>>, vector<1x32x32xf32>,
      %cst_26 = arith.constant 0.000000e+00 : f32
      %33 = vector.broadcast %cst_26 : f32 to vector<1x32x1xf32>
      %c0_27 = arith.constant 0 : index
      %c0_28 = arith.constant 0 : index
      %c0_29 = arith.constant 0 : index
      %34 = vector.load %arg4[%c0_27, %c0_28, %c0_29] : memref<1x32x1xf32, #tpu.memory_space<vmem>>, vector<1x32x1xf32>
      tpu.vector_store %arg4[%c0_27, %c0_28, %c0_29], %33 {strides = array<i32>} : memref<1x32x1xf32, #tpu.memory_space<vmem>>, vector<1x32x1xf32>,
    } else {
    }
    %cst = arith.constant 0.000000e+00 : f32
    %3 = vector.broadcast %cst : f32 to vector<32x32xf32>
    %cst_1 = arith.constant 0.000000e+00 : f32
    %4 = vector.broadcast %cst_1 : f32 to vector<32x1xf32>
    %c0 = arith.constant 0 : index
    %c0_2 = arith.constant 0 : index
    %c0_3 = arith.constant 0 : index
    %5 = vector.load %arg2[%c0, %c0_2, %c0_3] : memref<2x32x256xf32, #tpu.memory_space<vmem>>, vector<1x32x256xf32>
    %6 = vector.shape_cast %5 : vector<1x32x256xf32> to vector<32x256xf32>
    %cst_4 = arith.constant dense<0.000000e+00> : vector<32x32xf32>
    %7 = tpu.matmul %6, %6, %cst_4 {dimension_numbers = #tpu.dot_dimension_numbers<[1], [1], [0], [0], [0, 0, 1, 0], [], []>} : vector<32x256xf32>, vector<32x256xf32>, vector<32x32xf32> -> vector<32x32xf32>
    %8 = arith.addf %3, %7 : vector<32x32xf32>
    %cst_5 = arith.constant dense<0.000000e+00> : vector<32xf32>
    %9 = vector.multi_reduction <add>, %6, %cst_5 [1] : vector<32x256xf32> to vector<32xf32>
    %10 = vector.shape_cast %9 : vector<32xf32> to vector<32x1xf32>
    %11 = arith.addf %4, %10 : vector<32x1xf32>
    %c1 = arith.constant 1 : index
    %c0_6 = arith.constant 0 : index
    %c0_7 = arith.constant 0 : index
    %12 = vector.load %arg2[%c1, %c0_6, %c0_7] : memref<2x32x256xf32, #tpu.memory_space<vmem>>, vector<1x32x256xf32>
    %13 = vector.shape_cast %12 : vector<1x32x256xf32> to vector<32x256xf32>
    %cst_8 = arith.constant dense<0.000000e+00> : vector<32x32xf32>
    %14 = tpu.matmul %13, %13, %cst_8 {dimension_numbers = #tpu.dot_dimension_numbers<[1], [1], [0], [0], [0, 0, 1, 0], [], []>} : vector<32x256xf32>, vector<32x256xf32>, vector<32x32xf32> -> vector<32x32xf32>
    %15 = arith.addf %8, %14 : vector<32x32xf32>
    %cst_9 = arith.constant dense<0.000000e+00> : vector<32xf32>
    %16 = vector.multi_reduction <add>, %13, %cst_9 [1] : vector<32x256xf32> to vector<32xf32>
    %17 = vector.shape_cast %16 : vector<32xf32> to vector<32x1xf32>
    %18 = arith.addf %11, %17 : vector<32x1xf32>
    %c0_10 = arith.constant 0 : index
    %c0_11 = arith.constant 0 : index
    %c0_12 = arith.constant 0 : index
    %19 = vector.load %arg3[%c0_10, %c0_11, %c0_12] : memref<1x32x32xf32, #tpu.memory_space<vmem>>, vector<1x32x32xf32>
    %20 = vector.shape_cast %19 : vector<1x32x32xf32> to vector<32x32xf32>
    %21 = arith.addf %20, %15 : vector<32x32xf32>
    %c0_13 = arith.constant 0 : index
    %c0_14 = arith.constant 0 : index
    %c0_15 = arith.constant 0 : index
    %22 = vector.load %arg3[%c0_13, %c0_14, %c0_15] : memref<1x32x32xf32, #tpu.memory_space<vmem>>, vector<1x32x32xf32>
    %23 = vector.shape_cast %22 : vector<1x32x32xf32> to vector<32x32xf32>
    %24 = vector.shape_cast %21 : vector<32x32xf32> to vector<1x32x32xf32>
    tpu.vector_store %arg3[%c0_13, %c0_14, %c0_15], %24 {strides = array<i32>} : memref<1x32x32xf32, #tpu.memory_space<vmem>>, vector<1x32x32xf32>,
    %c0_16 = arith.constant 0 : index
    %c0_17 = arith.constant 0 : index
    %c0_18 = arith.constant 0 : index
    %25 = vector.load %arg4[%c0_16, %c0_17, %c0_18] : memref<1x32x1xf32, #tpu.memory_space<vmem>>, vector<1x32x1xf32>
    %26 = vector.shape_cast %25 : vector<1x32x1xf32> to vector<32x1xf32>
    %27 = arith.addf %26, %18 : vector<32x1xf32>
    %c0_19 = arith.constant 0 : index
    %c0_20 = arith.constant 0 : index
    %c0_21 = arith.constant 0 : index
    %28 = vector.load %arg4[%c0_19, %c0_20, %c0_21] : memref<1x32x1xf32, #tpu.memory_space<vmem>>, vector<1x32x1xf32>
    %29 = vector.shape_cast %28 : vector<1x32x1xf32> to vector<32x1xf32>
    %30 = vector.shape_cast %27 : vector<32x1xf32> to vector<1x32x1xf32>
    tpu.vector_store %arg4[%c0_19, %c0_20, %c0_21], %30 {strides = array<i32>} : memref<1x32x1xf32, #tpu.memory_space<vmem>>, vector<1x32x1xf32>,
    return
  }
  func.func @transform_0(%arg0: i32, %arg1: i32) -> (i32, i32, i32) {
    %c0_i32 = arith.constant 0 : i32
    %c0_i32_0 = arith.constant 0 : i32
    return %arg0, %c0_i32, %arg1 : i32, i32, i32
  }
  func.func @transform_1(%arg0: i32, %arg1: i32) -> (i32, i32, i32) {
    %c0_i32 = arith.constant 0 : i32
    %c0_i32_0 = arith.constant 0 : i32
    %c0_i32_1 = arith.constant 0 : i32
    return %arg0, %c0_i32, %c0_i32_0 : i32, i32, i32
  }
  func.func @transform_2(%arg0: i32, %arg1: i32) -> (i32, i32, i32) {
    %c0_i32 = arith.constant 0 : i32
    %c0_i32_0 = arith.constant 0 : i32
    %c0_i32_1 = arith.constant 0 : i32
    return %arg0, %c0_i32, %c0_i32_0 : i32, i32, i32
  }
}

module attributes {stable_mosaic.version = 11 : i64} {
  func.func @_apply_kernel(%arg0: i32, %arg1: i32, %arg2: memref<2x32x256xf32, #tpu.memory_space<vmem>>, %arg3: memref<1x32x32xf32, #tpu.memory_space<vmem>>, %arg4: memref<1x32x1xf32, #tpu.memory_space<vmem>>, %arg5: memref<64x32xf32, #tpu.memory_space<vmem>>, %arg6: memref<64x1xf32, #tpu.memory_space<vmem>>, %arg7: memref<64x1xf32, #tpu.memory_space<vmem>>, %arg8: memref<64x1xf32, #tpu.memory_space<vmem>>, %arg9: memref<64x64xf32, #tpu.memory_space<vmem>>, %arg10: memref<64x1xf32, #tpu.memory_space<vmem>>, %arg11: memref<2x64x256xf32, #tpu.memory_space<vmem>>) attributes {dimension_semantics = [#tpu.dimension_semantics<parallel>, #tpu.dimension_semantics<parallel>], iteration_bounds = array<i64: 1, 1>, scalar_prefetch = 0 : i64, scratch_operands = 0 : i64, tpu.core_type = #tpu.core_type<tc>, window_params = [{transform_indices = @transform_0, window_bounds = array<i64: 2, 32, 256>}, {pipeline_mode = #tpu.pipeline_mode<synchronous>, transform_indices = @transform_1, window_bounds = array<i64: 1, 32, 32>}, {pipeline_mode = #tpu.pipeline_mode<synchronous>, transform_indices = @transform_2, window_bounds = array<i64: 1, 32, 1>}, {pipeline_mode = #tpu.pipeline_mode<synchronous>, transform_indices = @transform_3, window_bounds = array<i64: 64, 32>}, {pipeline_mode = #tpu.pipeline_mode<synchronous>, transform_indices = @transform_4, window_bounds = array<i64: 64, 1>}, {pipeline_mode = #tpu.pipeline_mode<synchronous>, transform_indices = @transform_5, window_bounds = array<i64: 64, 1>}, {pipeline_mode = #tpu.pipeline_mode<synchronous>, transform_indices = @transform_6, window_bounds = array<i64: 64, 1>}, {pipeline_mode = #tpu.pipeline_mode<synchronous>, transform_indices = @transform_7, window_bounds = array<i64: 64, 64>}, {pipeline_mode = #tpu.pipeline_mode<synchronous>, transform_indices = @transform_8, window_bounds = array<i64: 64, 1>}, {transform_indices = @transform_9, window_bounds = array<i64: 2, 64, 256>}]} {
    %c0 = arith.constant 0 : index
    %c0_0 = arith.constant 0 : index
    %c0_1 = arith.constant 0 : index
    %0 = vector.load %arg3[%c0, %c0_0, %c0_1] : memref<1x32x32xf32, #tpu.memory_space<vmem>>, vector<1x32x32xf32>
    %cst = arith.constant dense<0.000000e+00> : vector<32x32xf32>
    %1 = vector.multi_reduction <add>, %0, %cst [0] : vector<1x32x32xf32> to vector<32x32xf32>
    %cst_2 = arith.constant 0.001953125 : f32
    %2 = vector.broadcast %cst_2 : f32 to vector<32x32xf32>
    %3 = arith.mulf %1, %2 : vector<32x32xf32>
    %c0_3 = arith.constant 0 : index
    %c0_4 = arith.constant 0 : index
    %c0_5 = arith.constant 0 : index
    %4 = vector.load %arg4[%c0_3, %c0_4, %c0_5] : memref<1x32x1xf32, #tpu.memory_space<vmem>>, vector<1x32x1xf32>
    %cst_6 = arith.constant dense<0.000000e+00> : vector<32x1xf32>
    %5 = vector.multi_reduction <add>, %4, %cst_6 [0] : vector<1x32x1xf32> to vector<32x1xf32>
    %cst_7 = arith.constant 0.001953125 : f32
    %6 = vector.broadcast %cst_7 : f32 to vector<32x1xf32>
    %7 = arith.mulf %5, %6 : vector<32x1xf32>
    %c0_8 = arith.constant 0 : index
    %c0_9 = arith.constant 0 : index
    %8 = vector.load %arg5[%c0_8, %c0_9] : memref<64x32xf32, #tpu.memory_space<vmem>>, vector<64x32xf32>
    %cst_10 = arith.constant dense<0.000000e+00> : vector<64x1xf32>
    %9 = tpu.matmul %8, %7, %cst_10 {dimension_numbers = #tpu.dot_dimension_numbers<[1], [0], [0], [1], [0, 0, 1, 1], [], []>} : vector<64x32xf32>, vector<32x1xf32>, vector<64x1xf32> -> vector<64x1xf32>
    %cst_11 = arith.constant dense<0.000000e+00> : vector<64x32xf32>
    %10 = tpu.matmul %8, %3, %cst_11 {dimension_numbers = #tpu.dot_dimension_numbers<[1], [0], [0], [1], [0, 0, 1, 1], [], []>} : vector<64x32xf32>, vector<32x32xf32>, vector<64x32xf32> -> vector<64x32xf32>
    %11 = arith.mulf %10, %8 : vector<64x32xf32>
    %cst_12 = arith.constant dense<0.000000e+00> : vector<64xf32>
    %12 = vector.multi_reduction <add>, %11, %cst_12 [1] : vector<64x32xf32> to vector<64xf32>
    %13 = vector.shape_cast %12 : vector<64xf32> to vector<64x1xf32>
    %14 = arith.mulf %9, %9 : vector<64x1xf32>
    %15 = arith.subf %13, %14 : vector<64x1xf32>
    %c0_13 = arith.constant 0 : index
    %c0_14 = arith.constant 0 : index
    %16 = vector.load %arg7[%c0_13, %c0_14] : memref<64x1xf32, #tpu.memory_space<vmem>>, vector<64x1xf32>
    %cst_15 = arith.constant 9.99999974E-6 : f32
    %17 = vector.broadcast %cst_15 : f32 to vector<64x1xf32>
    %18 = arith.addf %15, %17 : vector<64x1xf32>
    %19 = math.rsqrt %18 : vector<64x1xf32>
    %20 = arith.mulf %16, %19 : vector<64x1xf32>
    %c0_16 = arith.constant 0 : index
    %c0_17 = arith.constant 0 : index
    %21 = vector.load %arg9[%c0_16, %c0_17] : memref<64x64xf32, #tpu.memory_space<vmem>>, vector<64x64xf32>
    %22 = vector.broadcast %20 : vector<64x1xf32> to vector<64x32xf32>
    %23 = arith.mulf %22, %8 : vector<64x32xf32>
    %cst_18 = arith.constant dense<0.000000e+00> : vector<64x32xf32>
    %24 = tpu.matmul %21, %23, %cst_18 {dimension_numbers = #tpu.dot_dimension_numbers<[1], [0], [0], [1], [0, 0, 1, 1], [], []>} : vector<64x64xf32>, vector<64x32xf32>, vector<64x32xf32> -> vector<64x32xf32>
    %cst_19 = arith.constant 0.000000e+00 : f32
    %25 = vector.broadcast %cst_19 : f32 to vector<64x1xf32>
    %26 = arith.subf %25, %9 : vector<64x1xf32>
    %27 = arith.mulf %20, %26 : vector<64x1xf32>
    %c0_20 = arith.constant 0 : index
    %c0_21 = arith.constant 0 : index
    %28 = vector.load %arg8[%c0_20, %c0_21] : memref<64x1xf32, #tpu.memory_space<vmem>>, vector<64x1xf32>
    %29 = arith.addf %27, %28 : vector<64x1xf32>
    %cst_22 = arith.constant dense<0.000000e+00> : vector<64x1xf32>
    %30 = tpu.matmul %21, %29, %cst_22 {dimension_numbers = #tpu.dot_dimension_numbers<[1], [0], [0], [1], [0, 0, 1, 1], [], []>} : vector<64x64xf32>, vector<64x1xf32>, vector<64x1xf32> -> vector<64x1xf32>
    %c0_23 = arith.constant 0 : index
    %c0_24 = arith.constant 0 : index
    %31 = vector.load %arg10[%c0_23, %c0_24] : memref<64x1xf32, #tpu.memory_space<vmem>>, vector<64x1xf32>
    %32 = arith.addf %30, %31 : vector<64x1xf32>
    %c0_25 = arith.constant 0 : index
    %c0_26 = arith.constant 0 : index
    %c0_27 = arith.constant 0 : index
    %33 = vector.load %arg2[%c0_25, %c0_26, %c0_27] : memref<2x32x256xf32, #tpu.memory_space<vmem>>, vector<1x32x256xf32>
    %34 = vector.shape_cast %33 : vector<1x32x256xf32> to vector<32x256xf32>
    %cst_28 = arith.constant dense<0.000000e+00> : vector<64x256xf32>
    %35 = tpu.matmul %24, %34, %cst_28 {dimension_numbers = #tpu.dot_dimension_numbers<[1], [0], [0], [1], [0, 0, 1, 1], [], []>} : vector<64x32xf32>, vector<32x256xf32>, vector<64x256xf32> -> vector<64x256xf32>
    %36 = vector.broadcast %32 : vector<64x1xf32> to vector<64x256xf32>
    %37 = arith.addf %35, %36 : vector<64x256xf32>
    %c0_29 = arith.constant 0 : index
    %c0_30 = arith.constant 0 : index
    %c0_31 = arith.constant 0 : index
    %38 = vector.load %arg11[%c0_29, %c0_30, %c0_31] : memref<2x64x256xf32, #tpu.memory_space<vmem>>, vector<1x64x256xf32>
    %39 = vector.shape_cast %38 : vector<1x64x256xf32> to vector<64x256xf32>
    %40 = vector.shape_cast %37 : vector<64x256xf32> to vector<1x64x256xf32>
    tpu.vector_store %arg11[%c0_29, %c0_30, %c0_31], %40 {strides = array<i32>} : memref<2x64x256xf32, #tpu.memory_space<vmem>>, vector<1x64x256xf32>,
    %c1 = arith.constant 1 : index
    %c0_32 = arith.constant 0 : index
    %c0_33 = arith.constant 0 : index
    %41 = vector.load %arg2[%c1, %c0_32, %c0_33] : memref<2x32x256xf32, #tpu.memory_space<vmem>>, vector<1x32x256xf32>
    %42 = vector.shape_cast %41 : vector<1x32x256xf32> to vector<32x256xf32>
    %cst_34 = arith.constant dense<0.000000e+00> : vector<64x256xf32>
    %43 = tpu.matmul %24, %42, %cst_34 {dimension_numbers = #tpu.dot_dimension_numbers<[1], [0], [0], [1], [0, 0, 1, 1], [], []>} : vector<64x32xf32>, vector<32x256xf32>, vector<64x256xf32> -> vector<64x256xf32>
    %44 = vector.broadcast %32 : vector<64x1xf32> to vector<64x256xf32>
    %45 = arith.addf %43, %44 : vector<64x256xf32>
    %c1_35 = arith.constant 1 : index
    %c0_36 = arith.constant 0 : index
    %c0_37 = arith.constant 0 : index
    %46 = vector.load %arg11[%c1_35, %c0_36, %c0_37] : memref<2x64x256xf32, #tpu.memory_space<vmem>>, vector<1x64x256xf32>
    %47 = vector.shape_cast %46 : vector<1x64x256xf32> to vector<64x256xf32>
    %48 = vector.shape_cast %45 : vector<64x256xf32> to vector<1x64x256xf32>
    tpu.vector_store %arg11[%c1_35, %c0_36, %c0_37], %48 {strides = array<i32>} : memref<2x64x256xf32, #tpu.memory_space<vmem>>, vector<1x64x256xf32>,
    return
  }
  func.func @transform_0(%arg0: i32, %arg1: i32) -> (i32, i32, i32) {
    %c0_i32 = arith.constant 0 : i32
    %c0_i32_0 = arith.constant 0 : i32
    return %arg0, %c0_i32, %arg1 : i32, i32, i32
  }
  func.func @transform_1(%arg0: i32, %arg1: i32) -> (i32, i32, i32) {
    %c0_i32 = arith.constant 0 : i32
    %c0_i32_0 = arith.constant 0 : i32
    %c0_i32_1 = arith.constant 0 : i32
    %c0_i32_2 = arith.constant 0 : i32
    return %c0_i32, %c0_i32_0, %c0_i32_1 : i32, i32, i32
  }
  func.func @transform_2(%arg0: i32, %arg1: i32) -> (i32, i32, i32) {
    %c0_i32 = arith.constant 0 : i32
    %c0_i32_0 = arith.constant 0 : i32
    %c0_i32_1 = arith.constant 0 : i32
    %c0_i32_2 = arith.constant 0 : i32
    return %c0_i32, %c0_i32_0, %c0_i32_1 : i32, i32, i32
  }
  func.func @transform_3(%arg0: i32, %arg1: i32) -> (i32, i32) {
    %c0_i32 = arith.constant 0 : i32
    %c0_i32_0 = arith.constant 0 : i32
    %c0_i32_1 = arith.constant 0 : i32
    return %c0_i32, %c0_i32_0 : i32, i32
  }
  func.func @transform_4(%arg0: i32, %arg1: i32) -> (i32, i32) {
    %c0_i32 = arith.constant 0 : i32
    %c0_i32_0 = arith.constant 0 : i32
    %c0_i32_1 = arith.constant 0 : i32
    return %c0_i32, %c0_i32_0 : i32, i32
  }
  func.func @transform_5(%arg0: i32, %arg1: i32) -> (i32, i32) {
    %c0_i32 = arith.constant 0 : i32
    %c0_i32_0 = arith.constant 0 : i32
    %c0_i32_1 = arith.constant 0 : i32
    return %c0_i32, %c0_i32_0 : i32, i32
  }
  func.func @transform_6(%arg0: i32, %arg1: i32) -> (i32, i32) {
    %c0_i32 = arith.constant 0 : i32
    %c0_i32_0 = arith.constant 0 : i32
    %c0_i32_1 = arith.constant 0 : i32
    return %c0_i32, %c0_i32_0 : i32, i32
  }
  func.func @transform_7(%arg0: i32, %arg1: i32) -> (i32, i32) {
    %c0_i32 = arith.constant 0 : i32
    %c0_i32_0 = arith.constant 0 : i32
    %c0_i32_1 = arith.constant 0 : i32
    return %c0_i32, %c0_i32_0 : i32, i32
  }
  func.func @transform_8(%arg0: i32, %arg1: i32) -> (i32, i32) {
    %c0_i32 = arith.constant 0 : i32
    %c0_i32_0 = arith.constant 0 : i32
    %c0_i32_1 = arith.constant 0 : i32
    return %c0_i32, %c0_i32_0 : i32, i32
  }
  func.func @transform_9(%arg0: i32, %arg1: i32) -> (i32, i32, i32) {
    %c0_i32 = arith.constant 0 : i32
    %c0_i32_0 = arith.constant 0 : i32
    return %arg0, %c0_i32, %arg1 : i32, i32, i32
  }
}

</mosaic_0001>

<bundles_post_ra>
// kernel: model_forward.2
= control target key start
LH: loop header
LB: loop body
LE: loop exit
PB: predicated region body
PF: predicated region fallthrough
CT: control target
= control target key end

     0   :  { %vm14_vm0 = vcmask 261120   ;;  %v232_v24 = vmov 0.0   ;;  %vm19_vm1 = vcmask 7168   ;;  %s384_s0 = inlined_call_operand.vmem [shape: f32[2,32,256], index: 0, kind: input, shape index: {}]   ;;  %s385_s1 = inlined_call_operand.vmem [shape: f32[1,32,32], index: 1, kind: output, shape index: {0}]   ;;  %s386_s2 = inlined_call_operand.vmem [shape: f32[1,32,1], index: 2, kind: output, shape index: {1}]  }
   0x1   :  { %v30_v0 = vld [vmem:[%s384_s0 + $0x30] sm:$0xff]  ;;  %v31_v1 = vld [vmem:[%s384_s0 + $0x38] sm:$0xff]  ;;  %v28_v4 = vld [vmem:[%s384_s0 + $0x20] sm:$0xff]  ;;  %15 = vst.msk [vmem:[%s385_s1] sm:$0xff] %vm14_vm0, %v232_v24 }
   0x2   :  { %v229_v2 = vld [vmem:[%s384_s0 + $0x70] sm:$0xff]  ;;  %127 = vmatpush.xpose.msra.mxu2 %v30_v0  ;;  %156 = vmatpush.xpose.msra.mxu3 %v31_v1  ;;  %v230_v3 = vld [vmem:[%s384_s0 + $0x78] sm:$0xff]  ;;  %v29_v5 = vld [vmem:[%s384_s0 + $0x28] sm:$0xff]  ;;  %v41_v19 = vadd.f32 %v31_v1, %v30_v0  ;;  %16 = vst.msk [vmem:[%s385_s1 + $0x8] sm:$0xff] %vm14_vm0, %v232_v24 }
   0x3   :  { %69 = vmatpush.xpose.msra.mxu0 %v229_v2  ;;  %98 = vmatpush.xpose.msra.mxu1 %v230_v3  ;;  %v38_v6 = vadd.f32 %v29_v5, %v28_v4  ;;  %v227_v7 = vld [vmem:[%s384_s0 + $0x60] sm:$0xff]  ;;  %v228_v8 = vld [vmem:[%s384_s0 + $0x68] sm:$0xff]  ;;  %v26_v12 = vld [vmem:[%s384_s0 + $0x10] sm:$0xff]  ;;  %v182_v22 = vadd.f32 %v230_v3, %v229_v2  ;;  %17 = vst.msk [vmem:[%s385_s1 + $0x10] sm:$0xff] %vm14_vm0, %v232_v24 }
   0x4   :  { %v24_v9 = vld [vmem:[%s384_s0] sm:$0xff]  ;;  %v25_v10 = vld [vmem:[%s384_s0 + $0x8] sm:$0xff]  ;;  %v27_v13 = vld [vmem:[%s384_s0 + $0x18] sm:$0xff]  ;;  %v179_v23 = vadd.f32 %v228_v8, %v227_v7  ;;  %18 = vst.msk [vmem:[%s385_s1 + $0x18] sm:$0xff] %vm14_vm0, %v232_v24 }
   0x5   :  { %39 = vadd.xlane.f32.xlu1 %v38_v6  ;;  %v32_v11 = vadd.f32 %v25_v10, %v24_v9  ;;  %v225_v14 = vld [vmem:[%s384_s0 + $0x50] sm:$0xff]  ;;  %v226_v15 = vld [vmem:[%s384_s0 + $0x58] sm:$0xff]  ;;  %v223_v16 = vld [vmem:[%s384_s0 + $0x40] sm:$0xff]  ;;  %v35_v20 = vadd.f32 %v27_v13, %v26_v12  ;;  %20 = vst.msk [vmem:[%s386_s2] sm:$0xff] %vm19_vm1, %v232_v24 }
   0x6   :  { %128 = vmatpush.xpose.msra.mxu2 %v28_v4  ;;  %157 = vmatpush.xpose.msra.mxu3 %v29_v5  ;;  %v224_v17 = vld [vmem:[%s384_s0 + $0x48] sm:$0xff]  ;;  %v176_v21 = vadd.f32 %v226_v15, %v225_v14  ;;  %21 = vst.msk [vmem:[%s386_s2 + $0x8] sm:$0xff] %vm19_vm1, %v232_v24 }
   0x7   :  { %70 = vmatpush.xpose.msra.mxu0 %v227_v7  ;;  %99 = vmatpush.xpose.msra.mxu1 %v228_v8  ;;  %v173_v18 = vadd.f32 %v224_v17, %v223_v16  ;;  %22 = vst.msk [vmem:[%s386_s2 + $0x10] sm:$0xff] %vm19_vm1, %v232_v24 }
   0x8   :  { %33 = vadd.xlane.f32.xlu0 %v32_v11  ;;  %23 = vst.msk [vmem:[%s386_s2 + $0x18] sm:$0xff] %vm19_vm1, %v232_v24  ;;  %v189_v51 = vld [vmem:[%s385_s1] sm:$0xff] }
   0x9   :  { %174 = vadd.xlane.f32.xlu2 %v173_v18  ;;  %v190_v60 = vld [vmem:[%s385_s1 + $0x8] sm:$0xff] }
   0xa   :  { %129 = vmatpush.xpose.msra.mxu2 %v26_v12  ;;  %158 = vmatpush.xpose.msra.mxu3 %v27_v13 }
   0xb   :  { %71 = vmatpush.xpose.msra.mxu0 %v225_v14  ;;  %100 = vmatpush.xpose.msra.mxu1 %v226_v15 }
   0xc   :  { %v202_v28 = vld [vmem:[%s386_s2] sm:$0xff] }
   0xd   :  { %42 = vadd.xlane.f32.xlu1 %v41_v19  ;;  %v203_v33 = vld [vmem:[%s386_s2 + $0x8] sm:$0xff] }
   0xe   :  { %130 = vmatpush.xpose.msra.mxu2 %v24_v9  ;;  %159 = vmatpush.xpose.msra.mxu3 %v25_v10  ;;  %v204_v40 = vld [vmem:[%s386_s2 + $0x10] sm:$0xff] }
   0xf   :  { %72 = vmatpush.xpose.msra.mxu0 %v223_v16  ;;  %101 = vmatpush.xpose.msra.mxu1 %v224_v17  ;;  %v205_v36 = vld [vmem:[%s386_s2 + $0x18] sm:$0xff] }
  0x10   :  { %36 = vadd.xlane.f32.xlu0 %v35_v20 }
  0x11   :  { %131 = vmatmul.f32.vlgmr.msra.gmra.mxu2 %v24_v9  ;;  %160 = vmatmul.f32.vlgmr.msra.gmra.mxu3 %v25_v10 }
  0x12   :  { %73 = vmatmul.f32.vlgmr.msra.gmra.mxu0 %v223_v16  ;;  %102 = vmatmul.f32.vlgmr.msra.gmra.mxu1 %v224_v17 }
  0x13   :  { %177 = vadd.xlane.f32.xlu2 %v176_v21 }
  0x15   :  { %183 = vadd.xlane.f32.xlu1 %v182_v22 }
  0x18   :  { %180 = vadd.xlane.f32.xlu0 %v179_v23 }
  0x19   :  { %134 = vmatmul.f32.gmra.mxu2 %v26_v12  ;;  %163 = vmatmul.f32.gmra.mxu3 %v27_v13 }
  0x1a   :  { %76 = vmatmul.f32.gmra.mxu0 %v225_v14  ;;  %105 = vmatmul.f32.gmra.mxu1 %v226_v15  ;;  %v192_v14 = vld [vmem:[%s385_s1 + $0x18] sm:$0xff] }
  0x21   :  { %137 = vmatmul.f32.gmra.mxu2 %v28_v4  ;;  %166 = vmatmul.f32.gmra.mxu3 %v29_v5  ;;  %v191_v5 = vld [vmem:[%s385_s1 + $0x10] sm:$0xff] }
  0x22   :  { %79 = vmatmul.f32.gmra.mxu0 %v227_v7  ;;  %108 = vmatmul.f32.gmra.mxu1 %v228_v8 }
  0x29   :  { %140 = vmatmul.f32.gmra.mxu2 %v30_v0  ;;  %169 = vmatmul.f32.gmra.mxu3 %v31_v1 }
  0x2a   :  { %82 = vmatmul.f32.gmra.mxu0 %v229_v2  ;;  %111 = vmatmul.f32.gmra.mxu1 %v230_v3 }
  0x78   :  { %v40_v25 = vpop.xlane.xlu1 %39 }
  0x7b   :  { %v34_v26 = vpop.xlane.xlu0 %33 }
  0x7c   :  { %v175_v27 = vpop.xlane.xlu2 %174 }
  0x7d   :  { %v185_v29 = vadd.f32 %v175_v27, %v34_v26 }
  0x7f   :  { %v206_v31 = vadd.f32 %v202_v28, %v185_v29 }
  0x80   :  { %v43_v30 = vpop.xlane.xlu1 %42 }
  0x81   :  { %211 = vst.msk [vmem:[%s386_s2] sm:$0xff] %vm19_vm1, %v206_v31 }
  0x83   :  { %v37_v32 = vpop.xlane.xlu0 %36 }
  0x86   :  { %v178_v34 = vpop.xlane.xlu2 %177 }
  0x87   :  { %v186_v35 = vadd.f32 %v178_v34, %v37_v32 }
  0x88   :  { %v184_v37 = vpop.xlane.xlu1 %183 }
  0x89   :  { %v188_v38 = vadd.f32 %v184_v37, %v43_v30  ;;  %v207_v39 = vadd.f32 %v203_v33, %v186_v35 }
  0x8b   :  { %v181_v41 = vpop.xlane.xlu0 %180  ;;  %v209_v42 = vadd.f32 %v205_v36, %v188_v38  ;;  %212 = vst.msk [vmem:[%s386_s2 + $0x8] sm:$0xff] %vm19_vm1, %v207_v39 }
  0x8c   :  { %v187_v43 = vadd.f32 %v181_v41, %v40_v25 }
  0x8d   :  { %214 = vst.msk [vmem:[%s386_s2 + $0x18] sm:$0xff] %vm19_vm1, %v209_v42 }
  0x8e   :  { %v208_v44 = vadd.f32 %v204_v40, %v187_v43 }
  0x8f   :  { %v74_v45 = vpop.f32.mrf.mxu0  ;;  %v103_v46 = vpop.f32.mrf.mxu1 }
  0x90   :  { %213 = vst.msk [vmem:[%s386_s2 + $0x10] sm:$0xff] %vm19_vm1, %v208_v44  ;;  %v104_v47 = vadd.f32 %v103_v46, %v74_v45 }
  0x94   :  { %v132_v48 = vpop.f32.mrf.mxu2  ;;  %v161_v49 = vpop.f32.mrf.mxu3 }
  0x95   :  { %v133_v50 = vadd.f32 %v132_v48, %v104_v47 }
  0x97   :  { %v162_v52 = vadd.f32 %v161_v49, %v133_v50  ;;  %v77_v53 = vpop.f32.mrf.mxu0  ;;  %v106_v54 = vpop.f32.mrf.mxu1 }
  0x98   :  { %v107_v56 = vadd.f32 %v106_v54, %v77_v53 }
  0x99   :  { %v193_v55 = vadd.f32 %v189_v51, %v162_v52 }
  0x9b   :  { %198 = vst.msk [vmem:[%s385_s1] sm:$0xff] %vm14_vm0, %v193_v55 }
  0x9c   :  { %v135_v57 = vpop.f32.mrf.mxu2  ;;  %v164_v58 = vpop.f32.mrf.mxu3 }
  0x9d   :  { %v136_v59 = vadd.f32 %v135_v57, %v107_v56 }
  0x9f   :  { %v165_v61 = vadd.f32 %v164_v58, %v136_v59  ;;  %v80_v62 = vpop.f32.mrf.mxu0  ;;  %v109_v63 = vpop.f32.mrf.mxu1 }
  0xa0   :  { %v110_v1 = vadd.f32 %v109_v63, %v80_v62 }
  0xa1   :  { %v194_v0 = vadd.f32 %v190_v60, %v165_v61 }
  0xa3   :  { %199 = vst.msk [vmem:[%s385_s1 + $0x8] sm:$0xff] %vm14_vm0, %v194_v0 }
  0xa4   :  { %v138_v2 = vpop.f32.mrf.mxu2  ;;  %v167_v3 = vpop.f32.mrf.mxu3 }
  0xa5   :  { %v139_v4 = vadd.f32 %v138_v2, %v110_v1 }
  0xa7   :  { %v168_v6 = vadd.f32 %v167_v3, %v139_v4  ;;  %v83_v7 = vpop.f32.mrf.mxu0  ;;  %v112_v8 = vpop.f32.mrf.mxu1 }
  0xa8   :  { %v113_v10 = vadd.f32 %v112_v8, %v83_v7 }
  0xa9   :  { %v195_v9 = vadd.f32 %v191_v5, %v168_v6 }
  0xab   :  { %200 = vst.msk [vmem:[%s385_s1 + $0x10] sm:$0xff] %vm14_vm0, %v195_v9 }
  0xac   :  { %v141_v11 = vpop.f32.mrf.mxu2  ;;  %v170_v12 = vpop.f32.mrf.mxu3 }
  0xad   :  { %v142_v13 = vadd.f32 %v141_v11, %v113_v10 }
  0xaf   :  { %v171_v15 = vadd.f32 %v170_v12, %v142_v13 }
  0xb1   :  { %v196_v16 = vadd.f32 %v192_v14, %v171_v15 }
  0xb3   :  { %201 = vst.msk [vmem:[%s385_s1 + $0x18] sm:$0xff] %vm14_vm0, %v196_v16 }

// kernel: model_forward.3
= control target key start
LH: loop header
LB: loop body
LE: loop exit
PB: predicated region body
PF: predicated region fallthrough
CT: control target
= control target key end

     0   :  { %vm64_vm0 = vcmask 261120   ;;  %v916_v58 = vmov 0   ;;  %s1490_s1 = inlined_call_operand.vmem [shape: f32[1,32,32], index: 1, kind: input, shape index: {}]   ;;  %s1491_s4 = inlined_call_operand.vmem [shape: f32[64,1], index: 4, kind: input, shape index: {}]   ;;  %s1492_s3 = inlined_call_operand.vmem [shape: f32[64,32], index: 3, kind: input, shape index: {}]   ;;  %s1493_s2 = inlined_call_operand.vmem [shape: f32[1,32,1], index: 2, kind: input, shape index: {}]   ;;  %s1494_s5 = inlined_call_operand.vmem [shape: f32[64,1], index: 5, kind: input, shape index: {}]   ;;  %s1495_s6 = inlined_call_operand.vmem [shape: f32[64,1], index: 6, kind: input, shape index: {}]   ;;  %s1496_s7 = inlined_call_operand.vmem [shape: f32[64,64], index: 7, kind: input, shape index: {}]   ;;  %s1497_s8 = inlined_call_operand.vmem [shape: f32[64,1], index: 8, kind: input, shape index: {}]   ;;  %s1498_s0 = inlined_call_operand.vmem [shape: f32[2,32,256], index: 0, kind: input, shape index: {}]   ;;  %s1499_s9 = inlined_call_operand.vmem [shape: f32[2,64,256], index: 9, kind: output, shape index: {}]  }
   0x1   :  { %v35_v0 = vld [vmem:[%s1490_s1 + $0x18] sm:$0xff]  ;;  %v34_v1 = vld [vmem:[%s1490_s1 + $0x10] sm:$0xff]  ;;  %v33_v2 = vld [vmem:[%s1490_s1 + $0x8] sm:$0xff]  ;;  %898 = vset.pattern.permute.xlu1 %v916_v58  ;;  %899 = vset.pattern.permute.xlu2 %v916_v58 }
   0x2   :  { %v43_v3 = vmul.f32 0.001953125, %v35_v0  ;;  %v42_v4 = vmul.f32 0.001953125, %v34_v1  ;;  %v32_v5 = vld [vmem:[%s1490_s1] sm:$0xff]  ;;  %v41_v6 = vmul.f32 0.001953125, %v33_v2  ;;  %v989_v9 = vld [vmem:[%s1492_s3 + $0x8] sm:$0xff]  ;;  %v996_v10 = vld [vmem:[%s1492_s3 + $0x10] sm:$0xff]  ;;  %897 = vset.pattern.permute.xlu0 %v916_v58 }
   0x3   :  { %v40_v7 = vmul.f32 0.001953125, %v32_v5  ;;  %v982_v8 = vld [vmem:[%s1492_s3] sm:$0xff]  ;;  %v1003_v11 = vld [vmem:[%s1492_s3 + $0x18] sm:$0xff]  ;;  %v46_v13 = vld [vmem:[%s1493_s2 + $0x10] sm:$0xff] }
   0x4   :  { %142 = vmatpush.msra.mxu1 %v43_v3  ;;  %v47_v12 = vld [vmem:[%s1493_s2 + $0x18] sm:$0xff]  ;;  %v45_v14 = vld [vmem:[%s1493_s2 + $0x8] sm:$0xff]  ;;  %v54_v16 = vmul.f32 0.001953125, %v46_v13  ;;  %v44_v17 = vld [vmem:[%s1493_s2] sm:$0xff] }
   0x5   :  { %v55_v15 = vmul.f32 0.001953125, %v47_v12  ;;  %v53_v18 = vmul.f32 0.001953125, %v45_v14  ;;  %v1022_v19 = vld [vmem:[%s1492_s3 + $0x20] sm:$0xff]  ;;  %v52_v20 = vmul.f32 0.001953125, %v44_v17  ;;  %v1031_v21 = vld [vmem:[%s1492_s3 + $0x28] sm:$0xff]  ;;  %v1040_v22 = vld [vmem:[%s1492_s3 + $0x30] sm:$0xff] }
   0x6   :  { %143 = vmatpush.msra.mxu1 %v42_v4  ;;  %v1049_v23 = vld [vmem:[%s1492_s3 + $0x38] sm:$0xff] }
   0x7   :  { %101 = vmatpush.msra.mxu0 %v55_v15 }
   0x8   :  { %144 = vmatpush.msra.mxu1 %v41_v6 }
   0x9   :  { %102 = vmatpush.msra.mxu0 %v54_v16 }
   0xa   :  { %145 = vmatpush.msra.mxu1 %v40_v7 }
   0xb   :  { %816 = vmatmul.msk.f32.vlgmr.msra.gmra.mxu1 %vm64_vm0, %v982_v8  ;;  %103 = vmatpush.msra.mxu0 %v53_v18 }
   0xd   :  { %104 = vmatpush.msra.mxu0 %v52_v20 }
   0xe   :  { %808 = vmatmul.msk.f32.vlgmr.msra.gmra.mxu0 %vm64_vm0, %v982_v8 }
  0x13   :  { %817 = vmatmul.msk.f32.gmra.mxu1 %vm64_vm0, %v989_v9 }
  0x16   :  { %809 = vmatmul.msk.f32.gmra.mxu0 %vm64_vm0, %v989_v9 }
  0x1b   :  { %818 = vmatmul.msk.f32.gmra.mxu1 %vm64_vm0, %v996_v10 }
  0x1e   :  { %810 = vmatmul.msk.f32.gmra.mxu0 %vm64_vm0, %v996_v10 }
  0x23   :  { %819 = vmatmul.msk.f32.gmra.mxu1 %vm64_vm0, %v1003_v11 }
  0x26   :  { %811 = vmatmul.msk.f32.gmra.mxu0 %vm64_vm0, %v1003_v11 }
  0x2b   :  { %820 = vmatmul.msk.f32.gmra.mxu1 %vm64_vm0, %v1022_v19 }
  0x2e   :  { %812 = vmatmul.msk.f32.gmra.mxu0 %vm64_vm0, %v1022_v19 }
  0x33   :  { %821 = vmatmul.msk.f32.gmra.mxu1 %vm64_vm0, %v1031_v21 }
  0x36   :  { %813 = vmatmul.msk.f32.gmra.mxu0 %vm64_vm0, %v1031_v21 }
  0x3b   :  { %822 = vmatmul.msk.f32.gmra.mxu1 %vm64_vm0, %v1040_v22 }
  0x3e   :  { %814 = vmatmul.msk.f32.gmra.mxu0 %vm64_vm0, %v1040_v22 }
  0x43   :  { %823 = vmatmul.msk.f32.gmra.mxu1 %vm64_vm0, %v1049_v23 }
  0x46   :  { %815 = vmatmul.msk.f32.gmra.mxu0 %vm64_vm0, %v1049_v23 }
  0x88   :  { %v147_v24 = vpop.f32.mrf.mxu1 }
  0x89   :  { %v171_v39 = vmul.f32 %v147_v24, %v982_v8 }
  0x8b   :  { %v179_v42 = vsel %vm64_vm0, %v171_v39, 0.0  ;;  %v1079_v48 = vpop.f32.mrf.mxu0 }
  0x8c   :  { %v203_v24 = vmul.f32 %v1079_v48, %v1079_v48 }
  0x90   :  { %v150_v25 = vpop.f32.mrf.mxu1 }
  0x91   :  { %v172_v46 = vmul.f32 %v150_v25, %v989_v9 }
  0x93   :  { %v182_v47 = vsel %vm64_vm0, %v172_v46, 0.0  ;;  %v1081_v49 = vpop.f32.mrf.mxu0 }
  0x98   :  { %v153_v26 = vpop.f32.mrf.mxu1 }
  0x99   :  { %v173_v30 = vmul.f32 %v153_v26, %v996_v10 }
  0x9b   :  { %v185_v32 = vsel %vm64_vm0, %v173_v30, 0.0  ;;  %v1083_v50 = vpop.f32.mrf.mxu0 }
  0x9c   :  { %v205_v54 = vmul.f32 %v1083_v50, %v1083_v50 }
  0xa0   :  { %v156_v27 = vpop.f32.mrf.mxu1 }
  0xa1   :  { %v174_v28 = vmul.f32 %v156_v27, %v1003_v11 }
  0xa3   :  { %v188_v29 = vsel %vm64_vm0, %v174_v28, 0.0  ;;  %v1085_v51 = vpop.f32.mrf.mxu0 }
  0xa4   :  { %189 = vadd.xlane.f32.xlu2 %v188_v29  ;;  %v206_v1 = vmul.f32 %v1085_v51, %v1085_v51 }
  0xa8   :  { %v159_v31 = vpop.f32.mrf.mxu1 }
  0xa9   :  { %v175_v36 = vmul.f32 %v159_v31, %v1022_v19 }
  0xab   :  { %v191_v38 = vsel %vm64_vm0, %v175_v36, 0.0  ;;  %v1087_v52 = vpop.f32.mrf.mxu0 }
  0xac   :  { %186 = vadd.xlane.f32.xlu2 %v185_v32  ;;  %v207_v3 = vmul.f32 %v1087_v52, %v1087_v52 }
  0xb0   :  { %v162_v33 = vpop.f32.mrf.mxu1 }
  0xb1   :  { %v176_v34 = vmul.f32 %v162_v33, %v1031_v21 }
  0xb3   :  { %v194_v35 = vsel %vm64_vm0, %v176_v34, 0.0  ;;  %v1091_v55 = vpop.f32.mrf.mxu0 }
  0xb4   :  { %195 = vadd.xlane.f32.xlu1 %v194_v35  ;;  %v208_v60 = vmul.f32 %v1091_v55, %v1091_v55 }
  0xb8   :  { %v165_v37 = vpop.f32.mrf.mxu1 }
  0xb9   :  { %v177_v44 = vmul.f32 %v165_v37, %v1040_v22  ;;  %v224_v37 = vld [vmem:[%s1494_s5 + $0x28] sm:$0xff] }
  0xbb   :  { %v197_v45 = vsel %vm64_vm0, %v177_v44, 0.0  ;;  %v1095_v62 = vpop.f32.mrf.mxu0 }
  0xbc   :  { %192 = vadd.xlane.f32.xlu1 %v191_v38  ;;  %v209_v39 = vmul.f32 %v1095_v62, %v1095_v62 }
  0xc0   :  { %v168_v40 = vpop.f32.mrf.mxu1 }
  0xc1   :  { %v178_v41 = vmul.f32 %v168_v40, %v1049_v23 }
  0xc3   :  { %v200_v43 = vsel %vm64_vm0, %v178_v41, 0.0  ;;  %v1104_v12 = vpop.f32.mrf.mxu0 }
  0xc4   :  { %180 = vadd.xlane.f32.xlu1 %v179_v42  ;;  %201 = vadd.xlane.f32.xlu0 %v200_v43  ;;  %v210_v18 = vmul.f32 %v1104_v12, %v1104_v12 }
  0xcc   :  { %198 = vadd.xlane.f32.xlu0 %v197_v45 }
  0xd4   :  { %183 = vadd.xlane.f32.xlu0 %v182_v47 }
 0x117   :  { %v190_v53 = vpop.xlane.xlu2 %189 }
 0x118   :  { %v214_v4 = vsub.f32 %v190_v53, %v206_v1 }
 0x11a   :  { %v1106_v15 = vadd.f32 1e-05, %v214_v4 }
 0x11f   :  { %v187_v56 = vpop.xlane.xlu2 %186 }
 0x120   :  { %v213_v57 = vsub.f32 %v187_v56, %v205_v54 }
 0x122   :  { %v229_v59 = vadd.f32 1e-05, %v213_v57  ;;  %v225_v57 = vld [vmem:[%s1494_s5 + $0x30] sm:$0xff] }
 0x124   :  { %900 = vrsqrt.f32 %v229_v59  ;;  %vm261_vm5 = vweird.f32 %v229_v59 }
 0x127   :  { %v196_v61 = vpop.xlane.xlu1 %195 }
 0x128   :  { %v216_v63 = vsub.f32 %v196_v61, %v208_v60 }
 0x12a   :  { %v232_v0 = vadd.f32 1e-05, %v216_v63  ;;  %v1099_v2 = vpop.eup %900  ;;  %v221_v63 = vld [vmem:[%s1494_s5 + $0x10] sm:$0xff] }
 0x12b   :  { %v256_v5 = vmul.f32 %v1099_v2, %v229_v59  ;;  %vm262_vm4 = vweird.f32 %v1099_v2 }
 0x12c   :  { %902 = vrsqrt.f32 %v232_v0  ;;  %vm291_vm2 = vweird.f32 %v232_v0  ;;  %vm1134_vm7 = vmor %vm261_vm5, %vm262_vm4 }
 0x12d   :  { %v257_v16 = vmul.f32 %v1099_v2, %v256_v5 }
 0x12f   :  { %v193_v6 = vpop.xlane.xlu1 %192  ;;  %v258_v25 = vmul.f32 0.5, %v257_v16 }
 0x130   :  { %v215_v7 = vsub.f32 %v193_v6, %v207_v3 }
 0x131   :  { %v259_v35 = vsub.f32 1.5, %v258_v25 }
 0x132   :  { %v903_v13 = vpop.eup %902  ;;  %v231_v14 = vadd.f32 1e-05, %v215_v7  ;;  %v204_v7 = vmul.f32 %v1081_v49, %v1081_v49 }
 0x133   :  { %v286_v17 = vmul.f32 %v903_v13, %v232_v0  ;;  %vm292_vm1 = vweird.f32 %v903_v13  ;;  %v260_v46 = vmul.f32 %v1099_v2, %v259_v35  ;;  %v223_v0 = vld [vmem:[%s1494_s5 + $0x20] sm:$0xff]  ;;  %v226_v35 = vld [vmem:[%s1494_s5 + $0x38] sm:$0xff] }
 0x134   :  { %904 = vrsqrt.f32 %v231_v14  ;;  %vm293_vm3 = vmor %vm291_vm2, %vm292_vm1  ;;  %vm281_vm8 = vweird.f32 %v231_v14 }
 0x135   :  { %v287_v20 = vmul.f32 %v903_v13, %v286_v17  ;;  %906 = vrsqrt.f32 %v1106_v15  ;;  %v264_v59 = vsel %vm1134_vm7, %v1099_v2, %v260_v46 }
 0x137   :  { %v288_v26 = vmul.f32 0.5, %v287_v20  ;;  %v181_v27 = vpop.xlane.xlu1 %180  ;;  %v202_v28 = vpop.xlane.xlu0 %201 }
 0x138   :  { %v211_v29 = vsub.f32 %v181_v27, %v203_v24  ;;  %v218_v30 = vsub.f32 %v202_v28, %v210_v18 }
 0x139   :  { %v289_v31 = vsub.f32 1.5, %v288_v26 }
 0x13a   :  { %v905_v32 = vpop.eup %904  ;;  %v1114_v33 = vadd.f32 1e-05, %v211_v29  ;;  %v1116_v34 = vadd.f32 1e-05, %v218_v30  ;;  %v219_v30 = vld [vmem:[%s1494_s5] sm:$0xff] }
 0x13b   :  { %v276_v36 = vmul.f32 %v905_v32, %v231_v14  ;;  %v290_v38 = vmul.f32 %v903_v13, %v289_v31  ;;  %v1124_v40 = vpop.eup %906  ;;  %vm282_vm6 = vweird.f32 %v905_v32  ;;  %v1155_v14 = vmul.f32 %v264_v59, %v221_v63 }
 0x13c   :  { %908 = vrsqrt.f32 %v1114_v33  ;;  %v266_v47 = vmul.f32 %v1124_v40, %v1106_v15  ;;  %vm283_vm9 = vmor %vm281_vm8, %vm282_vm6  ;;  %vm241_vm12 = vweird.f32 %v1114_v33  ;;  %vm311_vm14 = vweird.f32 %v1116_v34 }
 0x13d   :  { %v277_v41 = vmul.f32 %v905_v32, %v276_v36  ;;  %910 = vrsqrt.f32 %v1116_v34  ;;  %v294_v42 = vsel %vm293_vm3, %v903_v13, %v290_v38  ;;  %vm272_vm1 = vweird.f32 %v1124_v40 }
 0x13e   :  { %v1127_v43 = vmul.f32 %v294_v42, %v224_v37  ;;  %v267_v3 = vmul.f32 %v1124_v40, %v266_v47  ;;  %vm271_vm3 = vweird.f32 %v1106_v15  ;;  %v450_v59 = vsub.f32 0.0, %v1091_v55  ;;  %v466_v55 = vld [vmem:[%s1495_s6 + $0x28] sm:$0xff] }
 0x13f   :  { %v278_v44 = vmul.f32 0.5, %v277_v41  ;;  %v199_v45 = vpop.xlane.xlu0 %198  ;;  %vm1183_vm4 = vmor %vm271_vm3, %vm272_vm1 }
 0x140   :  { %v217_v53 = vsub.f32 %v199_v45, %v209_v39  ;;  %358 = vperm.xlu1 %898, %v1127_v43   ;;  %v268_v18 = vmul.f32 0.5, %v267_v3 }
 0x141   :  { %v279_v54 = vsub.f32 1.5, %v278_v44 }
 0x142   :  { %v909_v56 = vpop.eup %908  ;;  %v1138_v58 = vadd.f32 1e-05, %v217_v53 }
 0x143   :  { %v911_v60 = vpop.eup %910  ;;  %v236_v61 = vmul.f32 %v909_v56, %v1114_v33  ;;  %v280_v1 = vmul.f32 %v905_v32, %v279_v54  ;;  %vm242_vm10 = vweird.f32 %v909_v56  ;;  %v452_v33 = vsub.f32 0.0, %v1104_v12 }
 0x144   :  { %v306_v4 = vmul.f32 %v911_v60, %v1116_v34  ;;  %912 = vrsqrt.f32 %v1138_v58  ;;  %vm312_vm11 = vweird.f32 %v911_v60  ;;  %vm243_vm13 = vmor %vm241_vm12, %vm242_vm10  ;;  %v468_v34 = vld [vmem:[%s1495_s6 + $0x38] sm:$0xff]  ;;  %vm301_vm5 = vweird.f32 %v1138_v58 }
 0x145   :  { %v237_v5 = vmul.f32 %v909_v56, %v236_v61  ;;  %v284_v6 = vsel %vm283_vm9, %v905_v32, %v280_v1  ;;  %v269_v32 = vsub.f32 1.5, %v268_v18  ;;  %vm313_vm15 = vmor %vm311_vm14, %vm312_vm11  ;;  %v222_v61 = vld [vmem:[%s1494_s5 + $0x18] sm:$0xff]  ;;  %vm379_vm10 = vcmask 523264  }
 0x146   :  { %v307_v13 = vmul.f32 %v911_v60, %v306_v4  ;;  %v1157_v2 = vmul.f32 %v284_v6, %v223_v0  ;;  %v451_v0 = vsub.f32 0.0, %v1095_v62  ;;  %v449_v6 = vsub.f32 0.0, %v1087_v52  ;;  %v465_v52 = vld [vmem:[%s1495_s6 + $0x20] sm:$0xff] }
 0x147   :  { %v238_v16 = vmul.f32 0.5, %v237_v5  ;;  %v184_v17 = vpop.xlane.xlu0 %183  ;;  %v270_v45 = vmul.f32 %v1124_v40, %v269_v32  ;;  %v467_v5 = vld [vmem:[%s1495_s6 + $0x30] sm:$0xff]  ;;  %v448_v62 = vsub.f32 0.0, %v1085_v51 }
 0x148   :  { %v308_v20 = vmul.f32 0.5, %v307_v13  ;;  %v212_v24 = vsub.f32 %v184_v17, %v204_v7  ;;  %343 = vperm.xlu1 %898, %v1155_v14   ;;  %353 = vperm.xlu2 %899, %v1157_v2   ;;  %v457_v17 = vmul.f32 %v449_v6, %v1157_v2  ;;  %v464_v2 = vld [vmem:[%s1495_s6 + $0x18] sm:$0xff] }
 0x149   :  { %v239_v25 = vsub.f32 1.5, %v238_v16  ;;  %v274_v15 = vsel %vm1183_vm4, %v1124_v40, %v270_v45  ;;  %v458_v40 = vmul.f32 %v450_v59, %v1127_v43  ;;  %v220_v43 = vld [vmem:[%s1494_s5 + $0x8] sm:$0xff]  ;;  %v1268_v45 = vld [vmem:[%s1496_s7 + $0x38] sm:$0xff] }
 0x14a   :  { %v913_v26 = vpop.eup %912  ;;  %v309_v27 = vsub.f32 1.5, %v308_v20  ;;  %v1161_v28 = vadd.f32 1e-05, %v212_v24  ;;  %v318_v4 = vmul.f32 %v274_v15, %v222_v61  ;;  %v447_v20 = vsub.f32 0.0, %v1083_v50  ;;  %v463_v50 = vld [vmem:[%s1495_s6 + $0x10] sm:$0xff]  ;;  %v863_v6 = vld [vmem:[%s1498_s0 + $0x78] sm:$0xff] }
 0x14b   :  { %v296_v29 = vmul.f32 %v913_v26, %v1138_v58  ;;  %v240_v31 = vmul.f32 %v909_v56, %v239_v25  ;;  %vm302_vm2 = vweird.f32 %v913_v26  ;;  %v474_v24 = vadd.f32 %v466_v55, %v458_v40  ;;  %v532_v55 = vld [vmem:[%s1498_s0 + $0x30] sm:$0xff] }
 0x14c   :  { %914 = vrsqrt.f32 %v1161_v28  ;;  %v310_v36 = vmul.f32 %v911_v60, %v309_v27  ;;  %vm303_vm6 = vmor %vm301_vm5, %vm302_vm2  ;;  %vm251_vm8 = vweird.f32 %v1161_v28  ;;  %v456_v51 = vmul.f32 %v448_v62, %v318_v4  ;;  %v533_v62 = vld [vmem:[%s1498_s0 + $0x38] sm:$0xff]  ;;  %610 = vmatpush.msrb.mxu0 %v532_v55 }
 0x14d   :  { %v297_v37 = vmul.f32 %v913_v26, %v296_v29  ;;  %v244_v38 = vsel %vm243_vm13, %v909_v56, %v240_v31  ;;  %v473_v27 = vadd.f32 %v465_v52, %v457_v17  ;;  %v455_v29 = vmul.f32 %v447_v20, %v1155_v14  ;;  %v461_v14 = vld [vmem:[%s1495_s6] sm:$0xff]  ;;  %651 = vmatpush.msrb.mxu1 %v533_v62  ;;  %v861_v17 = vld [vmem:[%s1498_s0 + $0x68] sm:$0xff]  ;;  %v859_v20 = vld [vmem:[%s1498_s0 + $0x58] sm:$0xff] }
 0x14e   :  { %v1174_v39 = vmul.f32 %v244_v38, %v219_v30  ;;  %v314_v41 = vsel %vm313_vm15, %v911_v60, %v310_v36  ;;  %v445_v30 = vsub.f32 0.0, %v1079_v48  ;;  %v472_v31 = vadd.f32 %v464_v2, %v456_v51  ;;  %v324_v38 = vld [vmem:[%s1496_s7 + $0x8] sm:$0xff]  ;;  %v530_v52 = vld [vmem:[%s1498_s0 + $0x20] sm:$0xff]  ;;  %v529_v51 = vld [vmem:[%s1498_s0 + $0x18] sm:$0xff] }
 0x14f   :  { %v298_v42 = vmul.f32 0.5, %v297_v37  ;;  %v322_v44 = vmul.f32 %v314_v41, %v226_v35  ;;  %v462_v35 = vld [vmem:[%s1495_s6 + $0x8] sm:$0xff]  ;;  %v323_v37 = vld [vmem:[%s1496_s7] sm:$0xff]  ;;  %v326_v41 = vld [vmem:[%s1496_s7 + $0x18] sm:$0xff]  ;;  %611 = vmatpush.msrb.mxu0 %v530_v52 }
 0x150   :  { %333 = vperm.xlu1 %898, %v1174_v39   ;;  %v453_v36 = vmul.f32 %v445_v30, %v1174_v39  ;;  %v325_v39 = vld [vmem:[%s1496_s7 + $0x10] sm:$0xff]  ;;  %v856_v2 = vld [vmem:[%s1498_s0 + $0x40] sm:$0xff] }
 0x151   :  { %v299_v46 = vsub.f32 1.5, %v298_v42  ;;  %368 = vperm.xlu2 %899, %v322_v44   ;;  %v460_v12 = vmul.f32 %v452_v33, %v322_v44  ;;  %v327_v42 = vld [vmem:[%s1496_s7 + $0x20] sm:$0xff]  ;;  %v328_v44 = vld [vmem:[%s1496_s7 + $0x28] sm:$0xff] }
 0x152   :  { %v915_v47 = vpop.eup %914  ;;  %v469_v48 = vadd.f32 %v461_v14, %v453_v36 }
 0x153   :  { %v246_v54 = vmul.f32 %v915_v47, %v1161_v28  ;;  %v476_v56 = vadd.f32 %v468_v34, %v460_v12  ;;  %v300_v60 = vmul.f32 %v913_v26, %v299_v46  ;;  %vm252_vm7 = vweird.f32 %v915_v47  ;;  %v1261_v34 = vld [vmem:[%s1496_s7 + $0x30] sm:$0xff] }
 0x154   :  { %vm253_vm9 = vmor %vm251_vm8, %vm252_vm7 }
 0x155   :  { %v247_v63 = vmul.f32 %v915_v47, %v246_v54  ;;  %493 = vmatpush.msra.mxu3 %v476_v56  ;;  %v304_v58 = vsel %vm303_vm6, %v913_v26, %v300_v60  ;;  %v446_v26 = vsub.f32 0.0, %v1081_v49  ;;  %v471_v49 = vadd.f32 %v463_v50, %v455_v29  ;;  %v482_v29 = vld [vmem:[%s1497_s8 + $0x28] sm:$0xff] }
 0x156   :  { %v321_v1 = vmul.f32 %v304_v58, %v225_v57 }
 0x157   :  { %v248_v3 = vmul.f32 0.5, %v247_v63 }
 0x158   :  { %363 = vperm.xlu0 %897, %v321_v1   ;;  %v459_v7 = vmul.f32 %v451_v0, %v321_v1 }
 0x159   :  { %v249_v13 = vsub.f32 1.5, %v248_v3  ;;  %348 = vperm.xlu2 %899, %v318_v4  }
 0x15a   :  { %v475_v16 = vadd.f32 %v467_v5, %v459_v7  ;;  %v862_v5 = vld [vmem:[%s1498_s0 + $0x70] sm:$0xff]  ;;  %v480_v7 = vld [vmem:[%s1497_s8 + $0x18] sm:$0xff] }
 0x15b   :  { %v250_v18 = vmul.f32 %v915_v47, %v249_v13 }
 0x15c   :  { %494 = vmatpush.msra.mxu3 %v475_v16  ;;  %v860_v16 = vld [vmem:[%s1498_s0 + $0x60] sm:$0xff] }
 0x15d   :  { %v254_v25 = vsel %vm253_vm9, %v915_v47, %v250_v18  ;;  %v858_v18 = vld [vmem:[%s1498_s0 + $0x50] sm:$0xff] }
 0x15e   :  { %495 = vmatpush.msra.mxu3 %v474_v24  ;;  %v316_v28 = vmul.f32 %v254_v25, %v220_v43  ;;  %v531_v43 = vld [vmem:[%s1498_s0 + $0x28] sm:$0xff]  ;;  %v528_v24 = vld [vmem:[%s1498_s0 + $0x10] sm:$0xff]  ;;  %v481_v25 = vld [vmem:[%s1497_s8 + $0x20] sm:$0xff] }
 0x15f   :  { %652 = vmatpush.msrb.mxu1 %v531_v43  ;;  %612 = vmatpush.msrb.mxu0 %v528_v24 }
 0x160   :  { %496 = vmatpush.msra.mxu3 %v473_v27  ;;  %v454_v32 = vmul.f32 %v446_v26, %v316_v28  ;;  %v857_v26 = vld [vmem:[%s1498_s0 + $0x48] sm:$0xff] }
 0x161   :  { %338 = vperm.xlu2 %899, %v316_v28   ;;  %653 = vmatpush.msrb.mxu1 %v529_v51 }
 0x162   :  { %497 = vmatpush.msra.mxu3 %v472_v31  ;;  %v470_v33 = vadd.f32 %v462_v35, %v454_v32  ;;  %v483_v31 = vld [vmem:[%s1497_s8 + $0x30] sm:$0xff] }
 0x164   :  { %498 = vmatpush.msra.mxu3 %v471_v49  ;;  %v484_v49 = vld [vmem:[%s1497_s8 + $0x38] sm:$0xff] }
 0x166   :  { %499 = vmatpush.msra.mxu3 %v470_v33  ;;  %v526_v33 = vld [vmem:[%s1498_s0] sm:$0xff] }
 0x167   :  { %613 = vmatpush.msrb.mxu0 %v526_v33 }
 0x168   :  { %500 = vmatpush.msra.mxu3 %v469_v48  ;;  %v527_v48 = vld [vmem:[%s1498_s0 + $0x8] sm:$0xff] }
 0x169   :  { %832 = vmatmul.msk.f32.vlgmr.msra.gmra.mxu3 %vm379_vm10, %v323_v37  ;;  %654 = vmatpush.msrb.mxu1 %v527_v48 }
 0x16a   :  { %758 = vmatpush.msrb.mxu3 %v863_v6 }
 0x16c   :  { %759 = vmatpush.msrb.mxu3 %v861_v17 }
 0x16e   :  { %760 = vmatpush.msrb.mxu3 %v859_v20 }
 0x170   :  { %761 = vmatpush.msrb.mxu3 %v857_v26 }
 0x171   :  { %833 = vmatmul.msk.f32.gmra.mxu3 %vm379_vm10, %v324_v38 }
 0x179   :  { %834 = vmatmul.msk.f32.gmra.mxu3 %vm379_vm10, %v325_v39 }
 0x181   :  { %835 = vmatmul.msk.f32.gmra.mxu3 %vm379_vm10, %v326_v41 }
 0x189   :  { %836 = vmatmul.msk.f32.gmra.mxu3 %vm379_vm10, %v327_v42 }
 0x191   :  { %837 = vmatmul.msk.f32.gmra.mxu3 %vm379_vm10, %v328_v44 }
 0x199   :  { %838 = vmatmul.msk.f32.gmra.mxu3 %vm379_vm10, %v1261_v34 }
 0x1a1   :  { %839 = vmatmul.msk.f32.gmra.mxu3 %vm379_vm10, %v1268_v45 }
 0x1a2   :  { %v354_v46 = vpop.permute.xlu2 %353 }
 0x1a3   :  { %v375_v15 = vmul.f32 %v354_v46, %v1022_v19 }
 0x1ab   :  { %v369_v12 = vpop.permute.xlu2 %368 }
 0x1ac   :  { %v378_v47 = vmul.f32 %v369_v12, %v1049_v23 }
 0x1ae   :  { %412 = vmatpush.msra.mxu2 %v378_v47 }
 0x1b2   :  { %v359_v53 = vpop.permute.xlu1 %358 }
 0x1b3   :  { %v349_v54 = vpop.permute.xlu2 %348  ;;  %v376_v61 = vmul.f32 %v359_v53, %v1031_v21 }
 0x1b4   :  { %v374_v63 = vmul.f32 %v349_v54, %v1003_v11  ;;  %v477_v11 = vld [vmem:[%s1497_s8] sm:$0xff] }
 0x1ba   :  { %v344_v56 = vpop.permute.xlu1 %343 }
 0x1bb   :  { %v339_v58 = vpop.permute.xlu2 %338  ;;  %v373_v59 = vmul.f32 %v344_v56, %v996_v10 }
 0x1bc   :  { %v372_v0 = vmul.f32 %v339_v58, %v989_v9 }
 0x1c2   :  { %v334_v23 = vpop.permute.xlu1 %333 }
 0x1c3   :  { %v371_v1 = vmul.f32 %v334_v23, %v982_v8  ;;  %v478_v8 = vld [vmem:[%s1497_s8 + $0x8] sm:$0xff] }
 0x1ca   :  { %v364_v57 = vpop.permute.xlu0 %363 }
 0x1cb   :  { %v377_v60 = vmul.f32 %v364_v57, %v1040_v22  ;;  %v479_v22 = vld [vmem:[%s1497_s8 + $0x10] sm:$0xff] }
 0x1cd   :  { %413 = vmatpush.msra.mxu2 %v377_v60 }
 0x1cf   :  { %414 = vmatpush.msra.mxu2 %v376_v61 }
 0x1d1   :  { %415 = vmatpush.msra.mxu2 %v375_v15 }
 0x1d3   :  { %416 = vmatpush.msra.mxu2 %v374_v63 }
 0x1d5   :  { %417 = vmatpush.msra.mxu2 %v373_v59 }
 0x1d7   :  { %418 = vmatpush.msra.mxu2 %v372_v0 }
 0x1d9   :  { %419 = vmatpush.msra.mxu2 %v371_v1 }
 0x1da   :  { %824 = vmatmul.msk.f32.vlgmr.msra.gmra.mxu2 %vm379_vm10, %v323_v37 }
 0x1db   :  { %717 = vmatpush.msrb.mxu2 %v862_v5 }
 0x1dd   :  { %718 = vmatpush.msrb.mxu2 %v860_v16 }
 0x1df   :  { %719 = vmatpush.msrb.mxu2 %v858_v18 }
 0x1e1   :  { %720 = vmatpush.msrb.mxu2 %v856_v2 }
 0x1e2   :  { %825 = vmatmul.msk.f32.gmra.mxu2 %vm379_vm10, %v324_v38 }
 0x1ea   :  { %826 = vmatmul.msk.f32.gmra.mxu2 %vm379_vm10, %v325_v39 }
 0x1ec   :  { %v502_v10 = vpop.f32.mrf.mxu3 }
 0x1ed   :  { %v503_v19 = vadd.f32 %v502_v10, %v477_v11 }
 0x1ef   :  { %536 = vperm.xlu0 %897, %v503_v19  }
 0x1f2   :  { %827 = vmatmul.msk.f32.gmra.mxu2 %vm379_vm10, %v326_v41 }
 0x1f4   :  { %v505_v9 = vpop.f32.mrf.mxu3 }
 0x1f5   :  { %v506_v21 = vadd.f32 %v505_v9, %v478_v8 }
 0x1f7   :  { %541 = vperm.xlu2 %899, %v506_v21  }
 0x1fa   :  { %828 = vmatmul.msk.f32.gmra.mxu2 %vm379_vm10, %v327_v42 }
 0x1fc   :  { %v508_v3 = vpop.f32.mrf.mxu3 }
 0x1fd   :  { %v509_v4 = vadd.f32 %v508_v3, %v479_v22 }
 0x1ff   :  { %546 = vperm.xlu1 %898, %v509_v4  }
 0x202   :  { %829 = vmatmul.msk.f32.gmra.mxu2 %vm379_vm10, %v328_v44 }
 0x204   :  { %v511_v40 = vpop.f32.mrf.mxu3 }
 0x205   :  { %v512_v13 = vadd.f32 %v511_v40, %v480_v7 }
 0x207   :  { %551 = vperm.xlu0 %897, %v512_v13  }
 0x20a   :  { %830 = vmatmul.msk.f32.gmra.mxu2 %vm379_vm10, %v1261_v34 }
 0x20c   :  { %v514_v27 = vpop.f32.mrf.mxu3 }
 0x20d   :  { %v515_v28 = vadd.f32 %v514_v27, %v481_v25 }
 0x20f   :  { %556 = vperm.xlu2 %899, %v515_v28  }
 0x212   :  { %831 = vmatmul.msk.f32.gmra.mxu2 %vm379_vm10, %v1268_v45 }
 0x214   :  { %v517_v50 = vpop.f32.mrf.mxu3 }
 0x215   :  { %v518_v30 = vadd.f32 %v517_v50, %v482_v29 }
 0x217   :  { %561 = vperm.xlu1 %898, %v518_v30  }
 0x21c   :  { %v520_v32 = vpop.f32.mrf.mxu3 }
 0x21d   :  { %v521_v35 = vadd.f32 %v520_v32, %v483_v31 }
 0x21f   :  { %566 = vperm.xlu0 %897, %v521_v35  }
 0x224   :  { %v523_v36 = vpop.f32.mrf.mxu3 }
 0x225   :  { %v524_v14 = vadd.f32 %v523_v36, %v484_v49 }
 0x227   :  { %571 = vperm.xlu2 %899, %v524_v14  }
 0x251   :  { %v542_v56 = vpop.permute.xlu2 %541 }
 0x25d   :  { %v421_v37 = vpop.f32.mrf.mxu2 }
 0x25e   :  { %840 = vmatmul.msk.f32.vlgmr.msrb.gmra.mxu0 %vm64_vm0, %v421_v37  ;;  %848 = vmatmul.msk.f32.vlgmr.msrb.gmra.mxu1 %vm64_vm0, %v421_v37 }
 0x25f   :  { %864 = vmatmul.msk.f32.vlgmr.msrb.gmra.mxu2 %vm64_vm0, %v421_v37  ;;  %872 = vmatmul.msk.f32.vlgmr.msrb.gmra.mxu3 %vm64_vm0, %v421_v37 }
 0x261   :  { %v537_v46 = vpop.permute.xlu0 %536 }
 0x265   :  { %v424_v38 = vpop.f32.mrf.mxu2 }
 0x266   :  { %841 = vmatmul.msk.f32.gmra.mxu0 %vm64_vm0, %v424_v38  ;;  %849 = vmatmul.msk.f32.gmra.mxu1 %vm64_vm0, %v424_v38 }
 0x267   :  { %865 = vmatmul.msk.f32.gmra.mxu2 %vm64_vm0, %v424_v38  ;;  %873 = vmatmul.msk.f32.gmra.mxu3 %vm64_vm0, %v424_v38 }
 0x269   :  { %v557_v16 = vpop.permute.xlu2 %556 }
 0x26d   :  { %v427_v39 = vpop.f32.mrf.mxu2 }
 0x26e   :  { %842 = vmatmul.msk.f32.gmra.mxu0 %vm64_vm0, %v427_v39  ;;  %850 = vmatmul.msk.f32.gmra.mxu1 %vm64_vm0, %v427_v39 }
 0x26f   :  { %866 = vmatmul.msk.f32.gmra.mxu2 %vm64_vm0, %v427_v39  ;;  %874 = vmatmul.msk.f32.gmra.mxu3 %vm64_vm0, %v427_v39 }
 0x271   :  { %v547_v0 = vpop.permute.xlu1 %546 }
 0x275   :  { %v430_v41 = vpop.f32.mrf.mxu2 }
 0x276   :  { %843 = vmatmul.msk.f32.gmra.mxu0 %vm64_vm0, %v430_v41  ;;  %851 = vmatmul.msk.f32.gmra.mxu1 %vm64_vm0, %v430_v41 }
 0x277   :  { %867 = vmatmul.msk.f32.gmra.mxu2 %vm64_vm0, %v430_v41  ;;  %875 = vmatmul.msk.f32.gmra.mxu3 %vm64_vm0, %v430_v41 }
 0x279   :  { %v552_v3 = vpop.permute.xlu0 %551 }
 0x27d   :  { %v433_v42 = vpop.f32.mrf.mxu2 }
 0x27e   :  { %844 = vmatmul.msk.f32.gmra.mxu0 %vm64_vm0, %v433_v42  ;;  %852 = vmatmul.msk.f32.gmra.mxu1 %vm64_vm0, %v433_v42 }
 0x27f   :  { %868 = vmatmul.msk.f32.gmra.mxu2 %vm64_vm0, %v433_v42  ;;  %876 = vmatmul.msk.f32.gmra.mxu3 %vm64_vm0, %v433_v42 }
 0x281   :  { %v572_v41 = vpop.permute.xlu2 %571 }
 0x285   :  { %v436_v44 = vpop.f32.mrf.mxu2 }
 0x286   :  { %845 = vmatmul.msk.f32.gmra.mxu0 %vm64_vm0, %v436_v44  ;;  %853 = vmatmul.msk.f32.gmra.mxu1 %vm64_vm0, %v436_v44 }
 0x287   :  { %869 = vmatmul.msk.f32.gmra.mxu2 %vm64_vm0, %v436_v44  ;;  %877 = vmatmul.msk.f32.gmra.mxu3 %vm64_vm0, %v436_v44 }
 0x289   :  { %v562_v2 = vpop.permute.xlu1 %561 }
 0x28d   :  { %v439_v34 = vpop.f32.mrf.mxu2 }
 0x28e   :  { %846 = vmatmul.msk.f32.gmra.mxu0 %vm64_vm0, %v439_v34  ;;  %854 = vmatmul.msk.f32.gmra.mxu1 %vm64_vm0, %v439_v34 }
 0x28f   :  { %870 = vmatmul.msk.f32.gmra.mxu2 %vm64_vm0, %v439_v34  ;;  %878 = vmatmul.msk.f32.gmra.mxu3 %vm64_vm0, %v439_v34 }
 0x291   :  { %v567_v35 = vpop.permute.xlu0 %566 }
 0x295   :  { %v442_v45 = vpop.f32.mrf.mxu2 }
 0x296   :  { %847 = vmatmul.msk.f32.gmra.mxu0 %vm64_vm0, %v442_v45  ;;  %855 = vmatmul.msk.f32.gmra.mxu1 %vm64_vm0, %v442_v45 }
 0x297   :  { %871 = vmatmul.msk.f32.gmra.mxu2 %vm64_vm0, %v442_v45  ;;  %879 = vmatmul.msk.f32.gmra.mxu3 %vm64_vm0, %v442_v45 }
 0x2db   :  { %v615_v12 = vpop.f32.mrf.mxu0  ;;  %v656_v47 = vpop.f32.mrf.mxu1 }
 0x2dc   :  { %v616_v53 = vadd.f32 %v615_v12, %v537_v46  ;;  %v657_v54 = vadd.f32 %v656_v47, %v537_v46 }
 0x2de   :  { %680 = vst [vmem:[%s1499_s9] sm:$0xff] %v616_v53 }
 0x2df   :  { %681 = vst [vmem:[%s1499_s9 + $0x8] sm:$0xff] %v657_v54 }
 0x2e2   :  { %v722_v57 = vpop.f32.mrf.mxu2  ;;  %v763_v60 = vpop.f32.mrf.mxu3 }
 0x2e3   :  { %v723_v61 = vadd.f32 %v722_v57, %v537_v46  ;;  %v764_v15 = vadd.f32 %v763_v60, %v537_v46  ;;  %v618_v63 = vpop.f32.mrf.mxu0  ;;  %v659_v58 = vpop.f32.mrf.mxu1 }
 0x2e4   :  { %v619_v59 = vadd.f32 %v618_v63, %v542_v56  ;;  %v660_v23 = vadd.f32 %v659_v58, %v542_v56 }
 0x2e5   :  { %880 = vst [vmem:[%s1499_s9 + $0x80] sm:$0xff] %v723_v61 }
 0x2e6   :  { %881 = vst [vmem:[%s1499_s9 + $0x88] sm:$0xff] %v764_v15 }
 0x2e7   :  { %682 = vst [vmem:[%s1499_s9 + $0x10] sm:$0xff] %v619_v59 }
 0x2e8   :  { %683 = vst [vmem:[%s1499_s9 + $0x18] sm:$0xff] %v660_v23 }
 0x2ea   :  { %v725_v1 = vpop.f32.mrf.mxu2  ;;  %v766_v11 = vpop.f32.mrf.mxu3 }
 0x2eb   :  { %v726_v10 = vadd.f32 %v725_v1, %v542_v56  ;;  %v767_v19 = vadd.f32 %v766_v11, %v542_v56  ;;  %v621_v8 = vpop.f32.mrf.mxu0  ;;  %v662_v9 = vpop.f32.mrf.mxu1 }
 0x2ec   :  { %v622_v21 = vadd.f32 %v621_v8, %v547_v0  ;;  %v663_v22 = vadd.f32 %v662_v9, %v547_v0 }
 0x2ed   :  { %882 = vst [vmem:[%s1499_s9 + $0x90] sm:$0xff] %v726_v10 }
 0x2ee   :  { %883 = vst [vmem:[%s1499_s9 + $0x98] sm:$0xff] %v767_v19 }
 0x2ef   :  { %684 = vst [vmem:[%s1499_s9 + $0x20] sm:$0xff] %v622_v21 }
 0x2f0   :  { %685 = vst [vmem:[%s1499_s9 + $0x28] sm:$0xff] %v663_v22 }
 0x2f2   :  { %v728_v4 = vpop.f32.mrf.mxu2  ;;  %v769_v5 = vpop.f32.mrf.mxu3 }
 0x2f3   :  { %v729_v6 = vadd.f32 %v728_v4, %v547_v0  ;;  %v770_v7 = vadd.f32 %v769_v5, %v547_v0  ;;  %v624_v40 = vpop.f32.mrf.mxu0  ;;  %v665_v13 = vpop.f32.mrf.mxu1 }
 0x2f4   :  { %v625_v55 = vadd.f32 %v624_v40, %v552_v3  ;;  %v666_v62 = vadd.f32 %v665_v13, %v552_v3 }
 0x2f5   :  { %884 = vst [vmem:[%s1499_s9 + $0xa0] sm:$0xff] %v729_v6 }
 0x2f6   :  { %885 = vst [vmem:[%s1499_s9 + $0xa8] sm:$0xff] %v770_v7 }
 0x2f7   :  { %686 = vst [vmem:[%s1499_s9 + $0x30] sm:$0xff] %v625_v55 }
 0x2f8   :  { %687 = vst [vmem:[%s1499_s9 + $0x38] sm:$0xff] %v666_v62 }
 0x2fa   :  { %v731_v17 = vpop.f32.mrf.mxu2  ;;  %v772_v52 = vpop.f32.mrf.mxu3 }
 0x2fb   :  { %v732_v43 = vadd.f32 %v731_v17, %v552_v3  ;;  %v773_v18 = vadd.f32 %v772_v52, %v552_v3  ;;  %v627_v20 = vpop.f32.mrf.mxu0  ;;  %v668_v24 = vpop.f32.mrf.mxu1 }
 0x2fc   :  { %v628_v51 = vadd.f32 %v627_v20, %v557_v16  ;;  %v669_v25 = vadd.f32 %v668_v24, %v557_v16 }
 0x2fd   :  { %886 = vst [vmem:[%s1499_s9 + $0xb0] sm:$0xff] %v732_v43 }
 0x2fe   :  { %887 = vst [vmem:[%s1499_s9 + $0xb8] sm:$0xff] %v773_v18 }
 0x2ff   :  { %688 = vst [vmem:[%s1499_s9 + $0x40] sm:$0xff] %v628_v51 }
 0x300   :  { %689 = vst [vmem:[%s1499_s9 + $0x48] sm:$0xff] %v669_v25 }
 0x302   :  { %v734_v26 = vpop.f32.mrf.mxu2  ;;  %v775_v27 = vpop.f32.mrf.mxu3 }
 0x303   :  { %v735_v28 = vadd.f32 %v734_v26, %v557_v16  ;;  %v776_v29 = vadd.f32 %v775_v27, %v557_v16  ;;  %v630_v50 = vpop.f32.mrf.mxu0  ;;  %v671_v30 = vpop.f32.mrf.mxu1 }
 0x304   :  { %v631_v31 = vadd.f32 %v630_v50, %v562_v2  ;;  %v672_v32 = vadd.f32 %v671_v30, %v562_v2 }
 0x305   :  { %888 = vst [vmem:[%s1499_s9 + $0xc0] sm:$0xff] %v735_v28 }
 0x306   :  { %889 = vst [vmem:[%s1499_s9 + $0xc8] sm:$0xff] %v776_v29 }
 0x307   :  { %690 = vst [vmem:[%s1499_s9 + $0x50] sm:$0xff] %v631_v31 }
 0x308   :  { %691 = vst [vmem:[%s1499_s9 + $0x58] sm:$0xff] %v672_v32 }
 0x30a   :  { %v737_v49 = vpop.f32.mrf.mxu2  ;;  %v778_v36 = vpop.f32.mrf.mxu3 }
 0x30b   :  { %v738_v14 = vadd.f32 %v737_v49, %v562_v2  ;;  %v779_v33 = vadd.f32 %v778_v36, %v562_v2  ;;  %v633_v48 = vpop.f32.mrf.mxu0  ;;  %v674_v37 = vpop.f32.mrf.mxu1 }
 0x30c   :  { %v634_v38 = vadd.f32 %v633_v48, %v567_v35  ;;  %v675_v39 = vadd.f32 %v674_v37, %v567_v35 }
 0x30d   :  { %890 = vst [vmem:[%s1499_s9 + $0xd0] sm:$0xff] %v738_v14 }
 0x30e   :  { %891 = vst [vmem:[%s1499_s9 + $0xd8] sm:$0xff] %v779_v33 }
 0x30f   :  { %692 = vst [vmem:[%s1499_s9 + $0x60] sm:$0xff] %v634_v38 }
 0x310   :  { %693 = vst [vmem:[%s1499_s9 + $0x68] sm:$0xff] %v675_v39 }
 0x312   :  { %v740_v42 = vpop.f32.mrf.mxu2  ;;  %v781_v44 = vpop.f32.mrf.mxu3 }
 0x313   :  { %v741_v34 = vadd.f32 %v740_v42, %v567_v35  ;;  %v782_v45 = vadd.f32 %v781_v44, %v567_v35  ;;  %v636_v46 = vpop.f32.mrf.mxu0  ;;  %v677_v12 = vpop.f32.mrf.mxu1 }
 0x314   :  { %v637_v47 = vadd.f32 %v636_v46, %v572_v41  ;;  %v678_v53 = vadd.f32 %v677_v12, %v572_v41 }
 0x315   :  { %892 = vst [vmem:[%s1499_s9 + $0xe0] sm:$0xff] %v741_v34 }
 0x316   :  { %893 = vst [vmem:[%s1499_s9 + $0xe8] sm:$0xff] %v782_v45 }
 0x317   :  { %694 = vst [vmem:[%s1499_s9 + $0x70] sm:$0xff] %v637_v47 }
 0x318   :  { %695 = vst [vmem:[%s1499_s9 + $0x78] sm:$0xff] %v678_v53 }
 0x31a   :  { %v743_v54 = vpop.f32.mrf.mxu2  ;;  %v784_v56 = vpop.f32.mrf.mxu3 }
 0x31b   :  { %v744_v57 = vadd.f32 %v743_v54, %v572_v41  ;;  %v785_v60 = vadd.f32 %v784_v56, %v572_v41 }
 0x31d   :  { %894 = vst [vmem:[%s1499_s9 + $0xf0] sm:$0xff] %v744_v57 }
 0x31e   :  { %895 = vst [vmem:[%s1499_s9 + $0xf8] sm:$0xff] %v785_v60 }

</bundles_post_ra>
